<compile_context>
chip_gen: v7x
topology: tpu7x:2x2x1
jax: 0.10.0
libtpu: 0.0.40
codegen_flags: <defaults>
</compile_context>

<pallas_src>
import jax
import jax.numpy as jnp
from jax.experimental import pallas as pl
from jax.experimental.pallas import tpu as pltpu

# ----------------------------------------------------------------------------
# Model constants (args.cascade_iterations1 / 2)
# ----------------------------------------------------------------------------
CASCADE_ONE = 3
CASCADE_TWO = 4
CASCADE_RATE_TWO = 1.0 / CASCADE_TWO   # kept for parity; fixed point elides the loop

_VMEM_SPEC = pl.BlockSpec(memory_space=pltpu.MemorySpace.VMEM)


# ----------------------------------------------------------------------------
# Pallas kernels (single fused kernel per model path, no grid)
# ----------------------------------------------------------------------------
def _forward_kernel(obs_ref, h0_ref, m_ref, w_ref, b_ref, out_ref):
    """forward(): actor_features = base(obs); cascade_one masked RNN steps.

    Weight slab rows: [W_base(D,H); W_ih(H,H); W_hh(H,H)]; bias rows: [b_base; b_rnn].
    """
    D = obs_ref.shape[1]
    H = h0_ref.shape[1]

    w_base = w_ref[pl.ds(0, D), :]
    w_ih = w_ref[pl.ds(D, H), :]
    w_hh = w_ref[pl.ds(D + H, H), :]
    b_base = b_ref[pl.ds(0, 1), :]
    b_rnn = b_ref[pl.ds(1, 1), :]

    # TODO(synk): MLPBase/CNNBase source not in reference; Linear+ReLU stand-in.
    x = jnp.maximum(
        jnp.dot(obs_ref[...], w_base, preferred_element_type=jnp.float32) + b_base,
        0.0)

    h = h0_ref[...]
    m = m_ref[...]  # (B, 1) -> lane-broadcast against (B, H)
    # TODO(synk): RNNLayer_Meta source not in reference; masked tanh recurrence stand-in.
    for _ in range(CASCADE_ONE):
        h = jnp.tanh(
            jnp.dot(x, w_ih, preferred_element_type=jnp.float32)
            + jnp.dot(h * m, w_hh, preferred_element_type=jnp.float32)
            + b_rnn)
        x = h

    # actor_features == updated rnn_states for this stand-in RNN -> single store.
    out_ref[...] = x
    # TODO(synk): ACTLayer (action distribution + sampling) source not in reference.


def _evaluate_kernel(obs_ref, h0_ref, m_ref, w_ref, b_ref, wager_ref):
    """evaluate_actions(): base -> layer_input -> RNN cascade -> SecondOrderNetwork.

    Weight slab rows: [W_base(D,H); W_in; W_ih; W_hh; W_c; W_w(cols padded to H)];
    bias rows: [b_base; b_in; b_rnn; b_c; b_w(padded)].
    """
    B, D = obs_ref.shape
    H = h0_ref.shape[1]

    w_base = w_ref[pl.ds(0, D), :]
    w_in = w_ref[pl.ds(D, H), :]
    w_ih = w_ref[pl.ds(D + H, H), :]
    w_hh = w_ref[pl.ds(D + 2 * H, H), :]
    w_c = w_ref[pl.ds(D + 3 * H, H), :]
    w_w = w_ref[pl.ds(D + 4 * H, H), :]
    b_base = b_ref[pl.ds(0, 1), :]
    b_in = b_ref[pl.ds(1, 1), :]
    b_rnn = b_ref[pl.ds(2, 1), :]
    b_c = b_ref[pl.ds(3, 1), :]
    b_w = b_ref[pl.ds(4, 1), :]

    # base(obs): Linear + ReLU stand-in (TODO(synk): MLPBase source not in reference).
    base = jnp.maximum(
        jnp.dot(obs_ref[...], w_base, preferred_element_type=jnp.float32) + b_base,
        0.0)

    # layer_input applied to base features AND rnn_states as ONE (2B,H)@(H,H) matmul.
    stacked = jnp.concatenate([base, h0_ref[...]], axis=0)
    proj = jnp.dot(stacked, w_in, preferred_element_type=jnp.float32) + b_in
    af = proj[:B, :]
    h = proj[B:, :]
    initial = af

    m = m_ref[...]
    x = af
    # TODO(synk): RNNLayer_Meta source not in reference; masked tanh recurrence stand-in.
    for _ in range(CASCADE_ONE):
        h = jnp.tanh(
            jnp.dot(x, w_ih, preferred_element_type=jnp.float32)
            + jnp.dot(h * m, w_hh, preferred_element_type=jnp.float32)
            + b_rnn)
        x = h

    # comparison_matrix = inital_states - actor_features_out
    cm = initial - x

    # SecondOrderNetwork cascade: prev_comparison starts as None, so prev0 = c0; with
    # dropout == identity (eval), rate*c0 + (1-rate)*c0 == c0 is a fixed point for all
    # cascade_two iterations -> only the final wager from c0 is needed.
    c0 = jnp.maximum(
        jnp.dot(cm, w_c, preferred_element_type=jnp.float32) + b_c, 0.0)
    wager_full = jnp.dot(c0, w_w, preferred_element_type=jnp.float32) + b_w
    wager_ref[...] = wager_full[:, :2]


# ----------------------------------------------------------------------------
# Parameters (deterministic, synthetic; consolidated into per-path slabs at init)
# ----------------------------------------------------------------------------
def init_params(key, obs_dim, hidden):
    ks = jax.random.split(key, 11)

    def lin_w(k, fi, fo):
        lim = 1.0 / jnp.sqrt(jnp.float32(fi))
        return jax.random.uniform(k, (fi, fo), jnp.float32, -lim, lim)

    def lin_b(k, fi, fo):
        lim = 1.0 / jnp.sqrt(jnp.float32(fi))
        return jax.random.uniform(k, (fo,), jnp.float32, -lim, lim)

    w_base = lin_w(ks[0], obs_dim, hidden)
    b_base = lin_b(ks[1], obs_dim, hidden)
    w_in = lin_w(ks[2], hidden, hidden)
    b_in = lin_b(ks[3], hidden, hidden)
    w_ih = lin_w(ks[4], hidden, hidden)
    w_hh = lin_w(ks[5], hidden, hidden)
    b_rnn = lin_b(ks[6], hidden, hidden)
    # SecondOrderNetwork init: comparison weight ~ U(-1,1), wager weight ~ U(0,0.1)
    w_c = jax.random.uniform(ks[7], (hidden, hidden), jnp.float32, -1.0, 1.0)
    b_c = lin_b(ks[8], hidden, hidden)
    w_w = jax.random.uniform(ks[9], (hidden, 2), jnp.float32, 0.0, 0.1)
    b_w = lin_b(ks[10], hidden, 2)

    # wager head padded (with zeros) to hidden columns so it stacks into the slab;
    # columns >= 2 of the wager output are exactly zero and dropped in-kernel.
    w_w_pad = jnp.pad(w_w, ((0, 0), (0, hidden - 2)))
    b_w_pad = jnp.pad(b_w, (0, hidden - 2))

    params = {
        "W_fwd": jnp.concatenate([w_base, w_ih, w_hh], axis=0),
        "b_fwd": jnp.stack([b_base, b_rnn], axis=0),
        "W_eval": jnp.concatenate([w_base, w_in, w_ih, w_hh, w_c, w_w_pad], axis=0),
        "b_eval": jnp.stack([b_base, b_in, b_rnn, b_c, b_w_pad], axis=0),
    }
    return params


# ----------------------------------------------------------------------------
# R_Actor_Meta forward / evaluate_actions (single fused pallas_call each)
# ----------------------------------------------------------------------------
def r_actor_meta_forward(params, obs, rnn_states, masks):
    B, H = rnn_states.shape
    actor_features = pl.pallas_call(
        _forward_kernel,
        out_shape=jax.ShapeDtypeStruct((B, H), jnp.float32),
        in_specs=[_VMEM_SPEC] * 5,
        out_specs=_VMEM_SPEC,
    )(obs, rnn_states, masks, params["W_fwd"], params["b_fwd"])
    # Stand-in RNN returns identical actor_features / hidden state: one store, two views.
    return actor_features, actor_features


def r_actor_meta_evaluate_actions(params, obs, rnn_states, masks):
    B = obs.shape[0]
    wager = pl.pallas_call(
        _evaluate_kernel,
        out_shape=jax.ShapeDtypeStruct((B, 2), jnp.float32),
        in_specs=[_VMEM_SPEC] * 5,
        out_specs=_VMEM_SPEC,
    )(obs, rnn_states, masks, params["W_eval"], params["b_eval"])
    return wager


# ----------------------------------------------------------------------------
# Pure-JAX references (full-precision) for correctness checking
# ----------------------------------------------------------------------------
def _ref_forward(params, obs, h0, masks):
    D, H = obs.shape[1], h0.shape[1]
    hp = jax.lax.Precision.HIGHEST
    w, b = params["W_fwd"], params["b_fwd"]
    w_base, w_ih, w_hh = w[:D], w[D:D + H], w[D + H:D + 2 * H]
    x = jnp.maximum(jnp.dot(obs, w_base, precision=hp) + b[0], 0.0)
    h = h0
    for _ in range(CASCADE_ONE):
        h = jnp.tanh(jnp.dot(x, w_ih, precision=hp)
                     + jnp.dot(h * masks, w_hh, precision=hp) + b[1])
        x = h
    return x


def _ref_evaluate(params, obs, h0, masks):
    D, H = obs.shape[1], h0.shape[1]
    hp = jax.lax.Precision.HIGHEST
    w, b = params["W_eval"], params["b_eval"]
    w_base, w_in = w[:D], w[D:D + H]
    w_ih, w_hh = w[D + H:D + 2 * H], w[D + 2 * H:D + 3 * H]
    w_c, w_w = w[D + 3 * H:D + 4 * H], w[D + 4 * H:D + 5 * H]
    base = jnp.maximum(jnp.dot(obs, w_base, precision=hp) + b[0], 0.0)
    af = jnp.dot(base, w_in, precision=hp) + b[1]
    h = jnp.dot(h0, w_in, precision=hp) + b[1]
    initial, x = af, af
    for _ in range(CASCADE_ONE):
        h = jnp.tanh(jnp.dot(x, w_ih, precision=hp)
                     + jnp.dot(h * masks, w_hh, precision=hp) + b[2])
        x = h
    cm = initial - x
    c0 = jnp.maximum(jnp.dot(cm, w_c, precision=hp) + b[3], 0.0)
    prev, wager = None, None
    for _ in range(CASCADE_TWO):
        comp = c0 if prev is None else CASCADE_RATE_TWO * c0 + (1 - CASCADE_RATE_TWO) * prev
        wager = jnp.dot(comp, w_w, precision=hp) + b[4]
        prev = comp
    return wager[:, :2]


# ----------------------------------------------------------------------------
if __name__ == "__main__":
    B, OBS_DIM, HIDDEN = 8, 32, 32

    key = jax.random.PRNGKey(0)
    k_obs, k_h, k_p = jax.random.split(key, 3)

    obs = jax.random.normal(k_obs, (B, OBS_DIM), jnp.float32)
    rnn_states = jax.random.normal(k_h, (B, HIDDEN), jnp.float32)  # recurrent_N = 1
    masks = jnp.ones((B, 1), jnp.float32)

    params = init_params(k_p, OBS_DIM, HIDDEN)

    fwd = jax.jit(r_actor_meta_forward)
    ev = jax.jit(r_actor_meta_evaluate_actions)

    # forward() path (up to the undefined ACTLayer)
    actor_features, new_rnn_states = fwd(params, obs, rnn_states, masks)
    # evaluate_actions() path -> wager
    wager = ev(params, obs, rnn_states, masks)

    jax.block_until_ready((actor_features, new_rnn_states, wager))

    assert actor_features.shape == (B, HIDDEN)
    assert new_rnn_states.shape == (B, HIDDEN)
    assert wager.shape == (B, 2)
    assert bool(jnp.all(jnp.isfinite(actor_features)))
    assert bool(jnp.all(jnp.isfinite(wager)))

    # Correctness vs full-precision pure-JAX references.
    ref_af = _ref_forward(params, obs, rnn_states, masks)
    ref_wager = _ref_evaluate(params, obs, rnn_states, masks)
    assert bool(jnp.allclose(actor_features, ref_af, atol=1e-4, rtol=1e-4))
    assert bool(jnp.allclose(wager, ref_wager, atol=1e-4, rtol=1e-4))

    print("KERNEL_OK")
</pallas_src>

<mosaic_0001>
module attributes {stable_mosaic.version = 11 : i64} {
  func.func @_forward_kernel(%arg0: memref<8x32xf32, #tpu.memory_space<vmem>>, %arg1: memref<8x32xf32, #tpu.memory_space<vmem>>, %arg2: memref<8x1xf32, #tpu.memory_space<vmem>>, %arg3: memref<96x32xf32, #tpu.memory_space<vmem>>, %arg4: memref<2x32xf32, #tpu.memory_space<vmem>>, %arg5: memref<8x32xf32, #tpu.memory_space<vmem>>) attributes {dimension_semantics = [], scalar_prefetch = 0 : i64, scratch_operands = 0 : i64, tpu.core_type = #tpu.core_type<tc>} {
    %c0 = arith.constant 0 : index
    %c0_0 = arith.constant 0 : index
    %0 = vector.load %arg3[%c0, %c0_0] : memref<96x32xf32, #tpu.memory_space<vmem>>, vector<32x32xf32>
    %c32 = arith.constant 32 : index
    %c0_1 = arith.constant 0 : index
    %1 = vector.load %arg3[%c32, %c0_1] : memref<96x32xf32, #tpu.memory_space<vmem>>, vector<32x32xf32>
    %c64 = arith.constant 64 : index
    %c0_2 = arith.constant 0 : index
    %2 = vector.load %arg3[%c64, %c0_2] : memref<96x32xf32, #tpu.memory_space<vmem>>, vector<32x32xf32>
    %c0_3 = arith.constant 0 : index
    %c0_4 = arith.constant 0 : index
    %3 = vector.load %arg4[%c0_3, %c0_4] : memref<2x32xf32, #tpu.memory_space<vmem>>, vector<1x32xf32>
    %c1 = arith.constant 1 : index
    %c0_5 = arith.constant 0 : index
    %4 = vector.load %arg4[%c1, %c0_5] : memref<2x32xf32, #tpu.memory_space<vmem>>, vector<1x32xf32>
    %c0_6 = arith.constant 0 : index
    %c0_7 = arith.constant 0 : index
    %5 = vector.load %arg0[%c0_6, %c0_7] : memref<8x32xf32, #tpu.memory_space<vmem>>, vector<8x32xf32>
    %cst = arith.constant dense<0.000000e+00> : vector<8x32xf32>
    %6 = tpu.matmul %5, %0, %cst {dimension_numbers = #tpu.dot_dimension_numbers<[1], [0], [0], [1], [0, 0, 1, 1], [], []>} : vector<8x32xf32>, vector<32x32xf32>, vector<8x32xf32> -> vector<8x32xf32>
    %7 = vector.broadcast %3 : vector<1x32xf32> to vector<8x32xf32>
    %8 = arith.addf %6, %7 : vector<8x32xf32>
    %cst_8 = arith.constant 0.000000e+00 : f32
    %9 = vector.broadcast %cst_8 : f32 to vector<8x32xf32>
    %10 = arith.maximumf %8, %9 : vector<8x32xf32>
    %c0_9 = arith.constant 0 : index
    %c0_10 = arith.constant 0 : index
    %11 = vector.load %arg1[%c0_9, %c0_10] : memref<8x32xf32, #tpu.memory_space<vmem>>, vector<8x32xf32>
    %c0_11 = arith.constant 0 : index
    %c0_12 = arith.constant 0 : index
    %12 = vector.load %arg2[%c0_11, %c0_12] : memref<8x1xf32, #tpu.memory_space<vmem>>, vector<8x1xf32>
    %cst_13 = arith.constant dense<0.000000e+00> : vector<8x32xf32>
    %13 = tpu.matmul %10, %1, %cst_13 {dimension_numbers = #tpu.dot_dimension_numbers<[1], [0], [0], [1], [0, 0, 1, 1], [], []>} : vector<8x32xf32>, vector<32x32xf32>, vector<8x32xf32> -> vector<8x32xf32>
    %14 = vector.broadcast %12 : vector<8x1xf32> to vector<8x32xf32>
    %15 = arith.mulf %11, %14 : vector<8x32xf32>
    %cst_14 = arith.constant dense<0.000000e+00> : vector<8x32xf32>
    %16 = tpu.matmul %15, %2, %cst_14 {dimension_numbers = #tpu.dot_dimension_numbers<[1], [0], [0], [1], [0, 0, 1, 1], [], []>} : vector<8x32xf32>, vector<32x32xf32>, vector<8x32xf32> -> vector<8x32xf32>
    %17 = arith.addf %13, %16 : vector<8x32xf32>
    %18 = vector.broadcast %4 : vector<1x32xf32> to vector<8x32xf32>
    %19 = arith.addf %17, %18 : vector<8x32xf32>
    %20 = math.tanh %19 : vector<8x32xf32>
    %cst_15 = arith.constant dense<0.000000e+00> : vector<8x32xf32>
    %21 = tpu.matmul %20, %1, %cst_15 {dimension_numbers = #tpu.dot_dimension_numbers<[1], [0], [0], [1], [0, 0, 1, 1], [], []>} : vector<8x32xf32>, vector<32x32xf32>, vector<8x32xf32> -> vector<8x32xf32>
    %22 = vector.broadcast %12 : vector<8x1xf32> to vector<8x32xf32>
    %23 = arith.mulf %20, %22 : vector<8x32xf32>
    %cst_16 = arith.constant dense<0.000000e+00> : vector<8x32xf32>
    %24 = tpu.matmul %23, %2, %cst_16 {dimension_numbers = #tpu.dot_dimension_numbers<[1], [0], [0], [1], [0, 0, 1, 1], [], []>} : vector<8x32xf32>, vector<32x32xf32>, vector<8x32xf32> -> vector<8x32xf32>
    %25 = arith.addf %21, %24 : vector<8x32xf32>
    %26 = vector.broadcast %4 : vector<1x32xf32> to vector<8x32xf32>
    %27 = arith.addf %25, %26 : vector<8x32xf32>
    %28 = math.tanh %27 : vector<8x32xf32>
    %cst_17 = arith.constant dense<0.000000e+00> : vector<8x32xf32>
    %29 = tpu.matmul %28, %1, %cst_17 {dimension_numbers = #tpu.dot_dimension_numbers<[1], [0], [0], [1], [0, 0, 1, 1], [], []>} : vector<8x32xf32>, vector<32x32xf32>, vector<8x32xf32> -> vector<8x32xf32>
    %30 = vector.broadcast %12 : vector<8x1xf32> to vector<8x32xf32>
    %31 = arith.mulf %28, %30 : vector<8x32xf32>
    %cst_18 = arith.constant dense<0.000000e+00> : vector<8x32xf32>
    %32 = tpu.matmul %31, %2, %cst_18 {dimension_numbers = #tpu.dot_dimension_numbers<[1], [0], [0], [1], [0, 0, 1, 1], [], []>} : vector<8x32xf32>, vector<32x32xf32>, vector<8x32xf32> -> vector<8x32xf32>
    %33 = arith.addf %29, %32 : vector<8x32xf32>
    %34 = vector.broadcast %4 : vector<1x32xf32> to vector<8x32xf32>
    %35 = arith.addf %33, %34 : vector<8x32xf32>
    %36 = math.tanh %35 : vector<8x32xf32>
    %c0_19 = arith.constant 0 : index
    %c0_20 = arith.constant 0 : index
    %37 = vector.load %arg5[%c0_19, %c0_20] : memref<8x32xf32, #tpu.memory_space<vmem>>, vector<8x32xf32>
    tpu.vector_store %arg5[%c0_19, %c0_20], %36 {strides = array<i32>} : memref<8x32xf32, #tpu.memory_space<vmem>>, vector<8x32xf32>,
    return
  }
}

</mosaic_0001>

<bundles_post_ra>
// kernel: r_actor_meta_forward.1
= control target key start
LH: loop header
LB: loop body
LE: loop exit
PB: predicated region body
PF: predicated region fallthrough
CT: control target
= control target key end

     0   :  { %v751_v0 = vmov 0.0|0.0   ;;  %vm752_vm0 = vmmov 0   ;;  %v753_v4 = vmov 0.0   ;;  %v754_v7 = vmov 0   ;;  %s875_s3 = inlined_call_operand.vmem [shape: f32[96,32], index: 3, kind: input, shape index: {}]   ;;  %s876_s2 = inlined_call_operand.vmem [shape: f32[8,1], index: 2, kind: input, shape index: {}]   ;;  %s877_s0 = inlined_call_operand.vmem [shape: f32[8,32], index: 0, kind: input, shape index: {}]   ;;  %s878_s1 = inlined_call_operand.vmem [shape: f32[8,32], index: 1, kind: input, shape index: {}]   ;;  %s879_s4 = inlined_call_operand.vmem [shape: f32[2,32], index: 4, kind: input, shape index: {}]   ;;  %s880_s5 = inlined_call_operand.vmem [shape: f32[8,32], index: 5, kind: output, shape index: {}]  }
   0x1   :  { %698 = vmatprep.subr.bf16.mxu0 %v751_v0  ;;  %v20_v1 = vld [vmem:[%s875_s3] sm:$0xff]  ;;  %v21_v2 = vld [vmem:[%s875_s3 + $0x8] sm:$0xff]  ;;  %v22_v3 = vld [vmem:[%s875_s3 + $0x10] sm:$0xff]  ;;  %629 = vmatprep.mubr.msk.f32.mxu0 %vm752_vm0, %v753_v4  ;;  %vm39_vm1 = vcmask 261120  }
   0x2   :  { %v699_v5 = vpack.c.bf16 %v21_v2, %v20_v1  ;;  %v23_v6 = vld [vmem:[%s875_s3 + $0x18] sm:$0xff]  ;;  %744 = vset.pattern.permute.xlu0 %v754_v7  ;;  %v115_v8 = vld [vmem:[%s876_s2] sm:$0xff]  ;;  %704 = vmatprep.subr.bf16.mxu1 %v751_v0  ;;  %v29_v10 = vld [vmem:[%s875_s3 + $0x48] sm:$0xff] }
   0x3   :  { %118 = vperm.xlu0 %744, %v115_v8   ;;  %v28_v9 = vld [vmem:[%s875_s3 + $0x40] sm:$0xff]  ;;  %640 = vmatprep.mubr.msk.f32.mxu1 %vm752_vm0, %v753_v4  ;;  %v702_v11 = vpack.c.bf16 %v23_v6, %v22_v3  ;;  %v25_v14 = vld [vmem:[%s875_s3 + $0x28] sm:$0xff]  ;;  %v30_v17 = vld [vmem:[%s875_s3 + $0x50] sm:$0xff] }
   0x4   :  { %700 = vmatpush3.bf16.msra.mxu0 %v699_v5  ;;  %v705_v12 = vpack.c.bf16 %v29_v10, %v28_v9  ;;  %v24_v13 = vld [vmem:[%s875_s3 + $0x20] sm:$0xff]  ;;  %v31_v18 = vld [vmem:[%s875_s3 + $0x58] sm:$0xff]  ;;  %v26_v20 = vld [vmem:[%s875_s3 + $0x30] sm:$0xff] }
   0x5   :  { %701 = vmatprep.subr.bf16.mxu0 %v751_v0  ;;  %v34_v15 = vld [vmem:[%s877_s0] sm:$0xff]  ;;  %v711_v16 = vpack.c.bf16 %v25_v14, %v24_v13  ;;  %v708_v19 = vpack.c.bf16 %v31_v18, %v30_v17  ;;  %v27_v21 = vld [vmem:[%s875_s3 + $0x38] sm:$0xff] }
   0x6   :  { %706 = vmatpush3.bf16.msra.mxu1 %v705_v12  ;;  %v714_v22 = vpack.c.bf16 %v27_v21, %v26_v20  ;;  %v114_v23 = vld [vmem:[%s878_s1] sm:$0xff] }
   0x7   :  { %707 = vmatprep.subr.bf16.mxu1 %v751_v0  ;;  %v577_v26 = vld [vmem:[%s879_s4] ss:$0 sm:$0xff]  ;;  %v581_v33 = vld [vmem:[%s879_s4 + $0x1] ss:$0 sm:$0xff] }
   0x8   :  { %703 = vmatpush3.bf16.msra.mxu0 %v702_v11 }
   0x9   :  { %710 = vmatprep.subr.bf16.mxu0 %v751_v0 }
   0xa   :  { %709 = vmatpush3.bf16.msra.mxu1 %v708_v19 }
   0xb   :  { %630 = vmatmul.mubr.msk.f32.vlgmr.msra.gmra.mrb[0].mxu0 %vm39_vm1, %v34_v15  ;;  %716 = vmatprep.subr.bf16.mxu1 %v751_v0 }
   0xc   :  { %712 = vmatpush3.bf16.msra.mxu0 %v711_v16  ;;  %651 = vmatprep.mubr.msk.f32.mxu0 %vm752_vm0, %v753_v4 }
   0xd   :  { %713 = vmatprep.subr.bf16.mxu0 %v751_v0 }
  0x10   :  { %715 = vmatpush3.bf16.msra.mxu0 %v714_v22 }
  0x11   :  { %722 = vmatprep.subr.bf16.mxu0 %v751_v0 }
  0x82   :  { %v119_v24 = vpop.permute.xlu0 %118 }
  0x83   :  { %v121_v25 = vmul.f32 %v119_v24, %v114_v23 }
  0x85   :  { %641 = vmatmul.mubr.msk.f32.vlgmr.msra.gmra.mrb[0].mxu1 %vm39_vm1, %v121_v25 }
  0x86   :  { %718 = vmatpush3.bf16.msra.mxu1 %v705_v12  ;;  %662 = vmatprep.mubr.msk.f32.mxu1 %vm752_vm0, %v753_v4 }
  0x87   :  { %719 = vmatprep.subr.bf16.mxu1 %v751_v0 }
  0x8a   :  { %721 = vmatpush3.bf16.msra.mxu1 %v708_v19 }
  0x8b   :  { %728 = vmatprep.subr.bf16.mxu1 %v751_v0 }
  0xde   :  { %v109_v27 = vpop.f32.mrb[0].mxu0 }
  0xdf   :  { %v110_v28 = vadd.f32 %v577_v26, %v109_v27  ;;  %v631_v29 = vpop.f32.mrb[1].mxu0 }
  0xe1   :  { %v113_v30 = vmax.f32 %v110_v28, 0.0 }
  0xe3   :  { %652 = vmatmul.mubr.msk.f32.vlgmr.msra.gmra.mrb[2].mxu0 %vm39_vm1, %v113_v30 }
  0xe4   :  { %724 = vmatpush3.bf16.msra.mxu0 %v711_v16  ;;  %673 = vmatprep.mubr.msk.f32.mxu0 %vm752_vm0, %v753_v4 }
  0xe5   :  { %725 = vmatprep.subr.bf16.mxu0 %v751_v0 }
  0xe8   :  { %727 = vmatpush3.bf16.msra.mxu0 %v714_v22 }
  0xe9   :  { %734 = vmatprep.subr.bf16.mxu0 %v751_v0 }
 0x158   :  { %v191_v31 = vpop.f32.mrb[0].mxu1 }
 0x159   :  { %v642_v32 = vpop.f32.mrb[1].mxu1 }
 0x1b6   :  { %v264_v34 = vpop.f32.mrb[2].mxu0 }
 0x1b7   :  { %v265_v35 = vadd.f32 %v264_v34, %v191_v31  ;;  %v653_v36 = vpop.f32.mrb[3].mxu0 }
 0x1b9   :  { %v272_v37 = vadd.f32 %v581_v33, %v265_v35 }
 0x1bb   :  { %745 = vtanh.f32 %v272_v37 }
 0x1c5   :  { %v746_v38 = vpop.eup %745 }
 0x1c6   :  { %674 = vmatmul.mubr.msk.f32.vlgmr.msra.gmra.mrb[4].mxu0 %vm39_vm1, %v746_v38  ;;  %v274_v39 = vmul.f32 %v746_v38, %v119_v24 }
 0x1c7   :  { %736 = vmatpush3.bf16.msra.mxu0 %v711_v16  ;;  %695 = vmatprep.mubr.msk.f32.mxu0 %vm752_vm0, %v753_v4 }
 0x1c8   :  { %663 = vmatmul.mubr.msk.f32.vlgmr.msra.gmra.mrb[2].mxu1 %vm39_vm1, %v274_v39  ;;  %737 = vmatprep.subr.bf16.mxu0 %v751_v0 }
 0x1c9   :  { %730 = vmatpush3.bf16.msra.mxu1 %v705_v12  ;;  %684 = vmatprep.mubr.msk.f32.mxu1 %vm752_vm0, %v753_v4 }
 0x1ca   :  { %731 = vmatprep.subr.bf16.mxu1 %v751_v0 }
 0x1cb   :  { %739 = vmatpush3.bf16.msra.mxu0 %v714_v22 }
 0x1cd   :  { %733 = vmatpush3.bf16.msra.mxu1 %v708_v19 }
 0x299   :  { %v417_v40 = vpop.f32.mrb[4].mxu0 }
 0x29a   :  { %v675_v41 = vpop.f32.mrb[5].mxu0 }
 0x29b   :  { %v344_v42 = vpop.f32.mrb[2].mxu1 }
 0x29c   :  { %v418_v43 = vadd.f32 %v417_v40, %v344_v42  ;;  %v664_v44 = vpop.f32.mrb[3].mxu1 }
 0x29e   :  { %v421_v45 = vadd.f32 %v581_v33, %v418_v43 }
 0x2a0   :  { %747 = vtanh.f32 %v421_v45 }
 0x2aa   :  { %v748_v46 = vpop.eup %747 }
 0x2ab   :  { %696 = vmatmul.mubr.msk.f32.vlgmr.msra.gmra.mrb[6].mxu0 %vm39_vm1, %v748_v46  ;;  %v423_v47 = vmul.f32 %v748_v46, %v119_v24 }
 0x2ad   :  { %685 = vmatmul.mubr.msk.f32.vlgmr.msra.gmra.mrb[4].mxu1 %vm39_vm1, %v423_v47 }
 0x37e   :  { %v566_v48 = vpop.f32.mrb[6].mxu0 }
 0x37f   :  { %v697_v49 = vpop.f32.mrb[7].mxu0 }
 0x380   :  { %v493_v50 = vpop.f32.mrb[4].mxu1 }
 0x381   :  { %v567_v51 = vadd.f32 %v566_v48, %v493_v50  ;;  %v686_v52 = vpop.f32.mrb[5].mxu1 }
 0x383   :  { %v570_v53 = vadd.f32 %v581_v33, %v567_v51 }
 0x385   :  { %749 = vtanh.f32 %v570_v53 }
 0x38f   :  { %v750_v54 = vpop.eup %749 }
 0x390   :  { %572 = vst.msk [vmem:[%s880_s5] sm:$0xff] %vm39_vm1, %v750_v54 }

</bundles_post_ra>
